<compile_context>
chip_gen: v5e
topology: v5e:2x2
jax: 0.10.0
libtpu: 0.0.40
codegen_flags: <defaults>
</compile_context>

<pallas_src>
import functools

import jax
import jax.numpy as jnp
from jax.experimental import pallas as pl
from jax.experimental.pallas import tpu as pltpu

_LANE = 128
_SUBLANE = 8
_NEG_BIG = -1e30  # bias value for padded (fake) class lanes


def _round_up(n: int, m: int) -> int:
    return ((n + m - 1) // m) * m


@functools.lru_cache(maxsize=1)
def _vmem_budget():
    """(workset_bytes, vmem_limit_bytes, desired_block_b) per TPU generation."""
    cap = 64 * 1024 * 1024  # conservative default (v7x: 64 MiB per TensorCore)
    try:
        info = pltpu.get_tpu_info()
        cap = int(getattr(info, "vmem_capacity_bytes", cap))
    except Exception:
        pass
    if cap <= 64 * 1024 * 1024:                       # v7x
        return 40 * 1024 * 1024, 56 * 1024 * 1024, 512
    return 80 * 1024 * 1024, 96 * 1024 * 1024, 1024   # v5e / v6e (128 MiB)


def _footprint(block_b, block_k, c_pad, in_itemsize, probs_itemsize):
    """Honest VMEM working-set estimate for one grid step."""
    x_bytes = 2 * block_b * block_k * in_itemsize              # double-buffered x
    w_bytes = 2 * block_k * c_pad * in_itemsize                # weight (2 bufs)
    bias_bytes = 2 * _SUBLANE * c_pad * 4                      # bias (padded rows)
    out_bytes = 2 * block_b * c_pad * (4 + probs_itemsize)     # logits + probs bufs
    tmp_bytes = 3 * block_b * c_pad * 4                        # softmax f32 temps
    return x_bytes + w_bytes + bias_bytes + out_bytes + tmp_bytes


def _pick_blocks(batch_pad8, num_features, c_pad, in_itemsize, probs_itemsize,
                 workset_bytes, desired_b, forced_block_b=None):
    """Pick (block_b, block_k) fitting the VMEM workset budget."""

    def fits(bb, bk):
        return _footprint(bb, bk, c_pad, in_itemsize, probs_itemsize) <= workset_bytes

    # Feature (K) tile: whole F when it fits at the minimum batch tile,
    # otherwise a multiple of 128 (F then gets zero-padded to a multiple of it).
    block_k = num_features
    if not fits(_SUBLANE, block_k):
        block_k = _round_up(num_features, _LANE)
        while block_k > _LANE and not fits(_SUBLANE, block_k):
            block_k = max(_LANE, _round_up(block_k // 2, _LANE))

    if forced_block_b is not None:
        return forced_block_b, block_k

    # block_b candidates: multiples of 8 that divide batch_pad8 -> no padded-x
    # copy beyond the (cheap) pad to a multiple of 8 rows.
    n8 = batch_pad8 // _SUBLANE
    candidates = sorted(_SUBLANE * d for d in range(1, n8 + 1) if n8 % d == 0)

    # Keep >= 4 batch-grid steps when batch allows so the "parallel" axis can
    # be sharded across v7x's two TensorCores.
    if batch_pad8 >= 4 * _SUBLANE:
        core_cap = _round_up(batch_pad8 // 4, _SUBLANE)
    else:
        core_cap = batch_pad8
    cap = max(_SUBLANE, min(desired_b, core_cap))

    block_b = _SUBLANE
    for c in candidates:
        if c <= cap and fits(c, block_k):
            block_b = c
    return block_b, block_k


def _linear_softmax_kernel(x_ref, w_ref, b_ref, logits_ref, probs_ref):
    """One (block_b, c_pad) output tile; feature (K) axis is grid axis 1.

    x_ref:      (block_b, block_k)  VMEM (f32 or bf16)
    w_ref:      (block_k, c_pad)    VMEM, pre-transposed (K, N) layout
    b_ref:      (1, c_pad)          VMEM f32; padded class lanes hold -1e30
    logits_ref: (block_b, c_pad)    f32 out; doubles as the K accumulator
    probs_ref:  (block_b, c_pad)    out (f32 by default)
    """
    k = pl.program_id(1)

    @pl.when(k == 0)
    def _init():
        # Bias is the accumulator's initial value (folds the bias add away).
        logits_ref[...] = jnp.broadcast_to(b_ref[...], logits_ref.shape)

    # Canonical (M,K)x(K,N) MXU contraction, f32 accumulation.
    logits_ref[...] += jnp.dot(x_ref[...], w_ref[...],
                               preferred_element_type=jnp.float32)

    @pl.when(k == pl.num_programs(1) - 1)
    def _finalize():
        logits = logits_ref[...]
        # Numerically stable softmax along the class axis (torch dim=1).
        # Padded class lanes carry a -1e30 bias => exp(pad - max) == 0 exactly.
        m = jnp.max(logits, axis=-1, keepdims=True)
        if probs_ref.dtype == jnp.float32:
            # exp in place into probs_ref: one fewer (block_b, c_pad) temporary.
            probs_ref[...] = jnp.exp(logits - m)
            e = probs_ref[...]
        else:
            e = jnp.exp(logits - m)
        s = jnp.sum(e, axis=-1, keepdims=True)
        r = pl.reciprocal(s, approx=True)   # EUP slot, ~free
        r = r * (2.0 - s * r)               # one Newton step -> ~f32-exact 1/s
        probs_ref[...] = (e * r).astype(probs_ref.dtype)


def prepare_params(weight, bias, *, use_bf16=False):
    """Hoisted, one-time parameter prep (call once at model init).

    weight: (num_classes, num_features) torch nn.Linear layout
    bias:   (num_classes,)
    Returns (w_t, b_pad, num_classes) where
      w_t:   (num_features, c_pad)  pre-transposed, class-padded with zeros
      b_pad: (1, c_pad)             f32, padded class lanes hold -1e30
    """
    num_classes, num_features = weight.shape
    c_pad = _round_up(max(num_classes, 1), _LANE)
    in_dtype = jnp.bfloat16 if use_bf16 else jnp.float32

    w_t = jnp.zeros((num_features, c_pad), dtype=in_dtype)
    w_t = w_t.at[:, :num_classes].set(jnp.transpose(weight).astype(in_dtype))
    b_pad = jnp.full((1, c_pad), _NEG_BIG, dtype=jnp.float32)
    b_pad = b_pad.at[0, :num_classes].set(bias.astype(jnp.float32))
    return w_t, b_pad, num_classes


@functools.partial(jax.jit, static_argnames=("num_classes", "block_b", "probs_dtype"))
def forward_prepared(x, w_t, b_pad, *, num_classes, block_b=None,
                     probs_dtype=jnp.float32):
    """Fused linear + softmax forward using pre-prepared (padded) params."""
    batch, num_features = x.shape
    wf, c_pad = w_t.shape
    assert wf == num_features, "w_t must be (num_features, c_pad)"
    in_dtype = w_t.dtype
    in_itemsize = jnp.dtype(in_dtype).itemsize
    probs_itemsize = jnp.dtype(probs_dtype).itemsize

    workset_bytes, vmem_limit_bytes, desired_b = _vmem_budget()

    batch_pad8 = _round_up(max(batch, 1), _SUBLANE)
    if block_b is not None:
        if block_b % _SUBLANE != 0 or batch_pad8 % block_b != 0:
            raise ValueError(
                "block_b must be a multiple of 8 that divides round_up(batch, 8)")
    block_b, block_k = _pick_blocks(batch_pad8, num_features, c_pad,
                                    in_itemsize, probs_itemsize,
                                    workset_bytes, desired_b,
                                    forced_block_b=block_b)

    # Input cast + (at most 7) pad rows; padded rows are computed and sliced away.
    x_in = x.astype(in_dtype)
    if batch_pad8 != batch:
        x_in = jnp.pad(x_in, ((0, batch_pad8 - batch), (0, 0)))

    # K tiling (only for very large num_features): zero-pad F on both operands.
    f_pad = _round_up(num_features, block_k)
    if f_pad != num_features:
        x_in = jnp.pad(x_in, ((0, 0), (0, f_pad - num_features)))
        w_in = jnp.pad(w_t, ((0, f_pad - num_features), (0, 0)))
    else:
        w_in = w_t

    grid = (batch_pad8 // block_b, f_pad // block_k)

    logits, probs = pl.pallas_call(
        _linear_softmax_kernel,
        out_shape=(
            jax.ShapeDtypeStruct((batch_pad8, c_pad), jnp.float32),
            jax.ShapeDtypeStruct((batch_pad8, c_pad), probs_dtype),
        ),
        grid_spec=pltpu.PrefetchScalarGridSpec(
            num_scalar_prefetch=0,
            grid=grid,
            in_specs=[
                pl.BlockSpec((block_b, block_k), lambda i, k: (i, k)),
                pl.BlockSpec((block_k, c_pad), lambda i, k: (k, 0)),
                pl.BlockSpec((1, c_pad), lambda i, k: (0, 0)),
            ],
            out_specs=[
                pl.BlockSpec((block_b, c_pad), lambda i, k: (i, 0)),
                pl.BlockSpec((block_b, c_pad), lambda i, k: (i, 0)),
            ],
        ),
        compiler_params=pltpu.CompilerParams(
            dimension_semantics=("parallel", "arbitrary"),
            vmem_limit_bytes=vmem_limit_bytes,
        ),
    )(x_in, w_in, b_pad)

    if batch_pad8 != batch or c_pad != num_classes:
        logits = logits[:batch, :num_classes]
        probs = probs[:batch, :num_classes]
    return logits, probs


def multiclass_softmax_forward(x, weight, bias, *, block_b=None, use_bf16=False,
                               probs_dtype=jnp.float32):
    """Convenience wrapper taking raw torch-layout params.

    For repeated inference, call prepare_params() once and use forward_prepared()
    directly to avoid re-padding/transposing the weight every call.
    """
    w_t, b_pad, num_classes = prepare_params(weight, bias, use_bf16=use_bf16)
    return forward_prepared(x, w_t, b_pad, num_classes=num_classes,
                            block_b=block_b, probs_dtype=probs_dtype)


if __name__ == "__main__":
    key = jax.random.PRNGKey(0)

    def reference(x, w, b):
        ref_logits = x @ w.T + b
        return ref_logits, jax.nn.softmax(ref_logits, axis=1)

    # ---- Case 1: small shapes matching the module, prepared-param path ------
    batch, num_features, num_classes = 8, 32, 10
    kx, kw, kb, kx2 = jax.random.split(key, 4)
    x = jax.random.normal(kx, (batch, num_features), dtype=jnp.float32)
    # The torch module zero-inits params (reset_weights); small random params
    # keep the softmax non-degenerate. Forward semantics are unchanged.
    weight = 0.1 * jax.random.normal(kw, (num_classes, num_features), dtype=jnp.float32)
    bias = 0.1 * jax.random.normal(kb, (num_classes,), dtype=jnp.float32)

    w_t, b_pad, nc = prepare_params(weight, bias)          # hoisted, done once
    logits, probs = forward_prepared(x, w_t, b_pad, num_classes=nc)
    jax.block_until_ready((logits, probs))
    ref_logits, ref_probs = reference(x, weight, bias)
    assert logits.shape == (batch, num_classes) and probs.shape == (batch, num_classes)
    assert jnp.allclose(logits, ref_logits, atol=1e-5, rtol=1e-5)
    assert jnp.allclose(probs, ref_probs, atol=1e-4, rtol=1e-4)
    assert jnp.allclose(jnp.sum(probs, axis=1), 1.0, atol=1e-4)

    # ---- Case 2: multi-step batch grid + ragged batch (batch % 8 != 0) ------
    batch2 = 50
    x2 = jax.random.normal(kx2, (batch2, num_features), dtype=jnp.float32)
    logits2, probs2 = multiclass_softmax_forward(x2, weight, bias)
    jax.block_until_ready((logits2, probs2))
    ref_logits2, ref_probs2 = reference(x2, weight, bias)
    assert logits2.shape == (batch2, num_classes)
    assert jnp.allclose(logits2, ref_logits2, atol=1e-5, rtol=1e-5)
    assert jnp.allclose(probs2, ref_probs2, atol=1e-4, rtol=1e-4)

    # ---- Case 3: bf16 MXU-input path (f32 accumulation), looser tolerance ---
    logits3, probs3 = multiclass_softmax_forward(x, weight, bias, use_bf16=True)
    jax.block_until_ready((logits3, probs3))
    assert jnp.allclose(logits3, ref_logits, atol=5e-2, rtol=5e-2)
    assert jnp.allclose(probs3, ref_probs, atol=2e-2, rtol=2e-2)
    assert jnp.allclose(jnp.sum(probs3, axis=1), 1.0, atol=1e-2)

    print("KERNEL_OK")
</pallas_src>

<mosaic_0001>
module attributes {stable_mosaic.version = 11 : i64} {
  func.func @_linear_softmax_kernel(%arg0: i32, %arg1: i32, %arg2: memref<8x32xf32, #tpu.memory_space<vmem>>, %arg3: memref<32x128xf32, #tpu.memory_space<vmem>>, %arg4: memref<1x128xf32, #tpu.memory_space<vmem>>, %arg5: memref<8x128xf32, #tpu.memory_space<vmem>>, %arg6: memref<8x128xf32, #tpu.memory_space<vmem>>) attributes {dimension_semantics = [#tpu.dimension_semantics<parallel>, #tpu.dimension_semantics<arbitrary>], iteration_bounds = array<i64: 1, 1>, scalar_prefetch = 0 : i64, scratch_operands = 0 : i64, tpu.core_type = #tpu.core_type<tc>, window_params = [{transform_indices = @transform_0, window_bounds = array<i64: 8, 32>}, {transform_indices = @transform_1, window_bounds = array<i64: 32, 128>}, {pipeline_mode = #tpu.pipeline_mode<synchronous>, transform_indices = @transform_2, window_bounds = array<i64: 1, 128>}, {transform_indices = @transform_3, window_bounds = array<i64: 8, 128>}, {transform_indices = @transform_4, window_bounds = array<i64: 8, 128>}]} {
    %c0_i32 = arith.constant 0 : i32
    %0 = arith.cmpi eq, %arg1, %c0_i32 : i32
    %1 = arith.extui %0 : i1 to i32
    %c0_i32_0 = arith.constant 0 : i32
    %2 = arith.cmpi ne, %1, %c0_i32_0 : i32
    scf.if %2 {
      %c0_10 = arith.constant 0 : index
      %c0_11 = arith.constant 0 : index
      %12 = vector.load %arg4[%c0_10, %c0_11] : memref<1x128xf32, #tpu.memory_space<vmem>>, vector<1x128xf32>
      %13 = vector.shape_cast %12 : vector<1x128xf32> to vector<1x128xf32>
      %14 = vector.broadcast %13 : vector<1x128xf32> to vector<8x128xf32>
      %c0_12 = arith.constant 0 : index
      %c0_13 = arith.constant 0 : index
      %15 = vector.load %arg5[%c0_12, %c0_13] : memref<8x128xf32, #tpu.memory_space<vmem>>, vector<8x128xf32>
      tpu.vector_store %arg5[%c0_12, %c0_13], %14 {strides = array<i32>} : memref<8x128xf32, #tpu.memory_space<vmem>>, vector<8x128xf32>,
    } else {
    }
    %c0 = arith.constant 0 : index
    %c0_1 = arith.constant 0 : index
    %3 = vector.load %arg5[%c0, %c0_1] : memref<8x128xf32, #tpu.memory_space<vmem>>, vector<8x128xf32>
    %c0_2 = arith.constant 0 : index
    %c0_3 = arith.constant 0 : index
    %4 = vector.load %arg2[%c0_2, %c0_3] : memref<8x32xf32, #tpu.memory_space<vmem>>, vector<8x32xf32>
    %c0_4 = arith.constant 0 : index
    %c0_5 = arith.constant 0 : index
    %5 = vector.load %arg3[%c0_4, %c0_5] : memref<32x128xf32, #tpu.memory_space<vmem>>, vector<32x128xf32>
    %cst = arith.constant dense<0.000000e+00> : vector<8x128xf32>
    %6 = tpu.matmul %4, %5, %cst {dimension_numbers = #tpu.dot_dimension_numbers<[1], [0], [0], [1], [0, 0, 1, 1], [], []>} : vector<8x32xf32>, vector<32x128xf32>, vector<8x128xf32> -> vector<8x128xf32>
    %7 = arith.addf %3, %6 : vector<8x128xf32>
    %c0_6 = arith.constant 0 : index
    %c0_7 = arith.constant 0 : index
    %8 = vector.load %arg5[%c0_6, %c0_7] : memref<8x128xf32, #tpu.memory_space<vmem>>, vector<8x128xf32>
    tpu.vector_store %arg5[%c0_6, %c0_7], %7 {strides = array<i32>} : memref<8x128xf32, #tpu.memory_space<vmem>>, vector<8x128xf32>,
    %c0_i32_8 = arith.constant 0 : i32
    %9 = arith.cmpi eq, %arg1, %c0_i32_8 : i32
    %10 = arith.extui %9 : i1 to i32
    %c0_i32_9 = arith.constant 0 : i32
    %11 = arith.cmpi ne, %10, %c0_i32_9 : i32
    scf.if %11 {
      %c0_10 = arith.constant 0 : index
      %c0_11 = arith.constant 0 : index
      %12 = vector.load %arg5[%c0_10, %c0_11] : memref<8x128xf32, #tpu.memory_space<vmem>>, vector<8x128xf32>
      %cst_12 = arith.constant dense<0xFF800000> : vector<8xf32>
      %13 = vector.multi_reduction <maximumf>, %12, %cst_12 [1] : vector<8x128xf32> to vector<8xf32>
      %14 = vector.shape_cast %13 : vector<8xf32> to vector<8x1xf32>
      %15 = vector.broadcast %14 : vector<8x1xf32> to vector<8x128xf32>
      %16 = arith.subf %12, %15 : vector<8x128xf32>
      %17 = math.exp %16 : vector<8x128xf32>
      %c0_13 = arith.constant 0 : index
      %c0_14 = arith.constant 0 : index
      %18 = vector.load %arg6[%c0_13, %c0_14] : memref<8x128xf32, #tpu.memory_space<vmem>>, vector<8x128xf32>
      tpu.vector_store %arg6[%c0_13, %c0_14], %17 {strides = array<i32>} : memref<8x128xf32, #tpu.memory_space<vmem>>, vector<8x128xf32>,
      %c0_15 = arith.constant 0 : index
      %c0_16 = arith.constant 0 : index
      %19 = vector.load %arg6[%c0_15, %c0_16] : memref<8x128xf32, #tpu.memory_space<vmem>>, vector<8x128xf32>
      %cst_17 = arith.constant dense<0.000000e+00> : vector<8xf32>
      %20 = vector.multi_reduction <add>, %19, %cst_17 [1] : vector<8x128xf32> to vector<8xf32>
      %21 = vector.shape_cast %20 : vector<8xf32> to vector<8x1xf32>
      %22 = tpu.reciprocal %21 {approx = true} : vector<8x1xf32> -> vector<8x1xf32>
      %23 = arith.mulf %21, %22 : vector<8x1xf32>
      %cst_18 = arith.constant 2.000000e+00 : f32
      %24 = vector.broadcast %cst_18 : f32 to vector<8x1xf32>
      %25 = arith.subf %24, %23 : vector<8x1xf32>
      %26 = arith.mulf %22, %25 : vector<8x1xf32>
      %27 = vector.broadcast %26 : vector<8x1xf32> to vector<8x128xf32>
      %28 = arith.mulf %19, %27 : vector<8x128xf32>
      %c0_19 = arith.constant 0 : index
      %c0_20 = arith.constant 0 : index
      %29 = vector.load %arg6[%c0_19, %c0_20] : memref<8x128xf32, #tpu.memory_space<vmem>>, vector<8x128xf32>
      tpu.vector_store %arg6[%c0_19, %c0_20], %28 {strides = array<i32>} : memref<8x128xf32, #tpu.memory_space<vmem>>, vector<8x128xf32>,
    } else {
    }
    return
  }
  func.func @transform_0(%arg0: i32, %arg1: i32) -> (i32, i32) {
    %c0_i32 = arith.constant 0 : i32
    return %arg0, %arg1 : i32, i32
  }
  func.func @transform_1(%arg0: i32, %arg1: i32) -> (i32, i32) {
    %c0_i32 = arith.constant 0 : i32
    %c0_i32_0 = arith.constant 0 : i32
    return %arg1, %c0_i32 : i32, i32
  }
  func.func @transform_2(%arg0: i32, %arg1: i32) -> (i32, i32) {
    %c0_i32 = arith.constant 0 : i32
    %c0_i32_0 = arith.constant 0 : i32
    %c0_i32_1 = arith.constant 0 : i32
    return %c0_i32, %c0_i32_0 : i32, i32
  }
  func.func @transform_3(%arg0: i32, %arg1: i32) -> (i32, i32) {
    %c0_i32 = arith.constant 0 : i32
    %c0_i32_0 = arith.constant 0 : i32
    return %arg0, %c0_i32 : i32, i32
  }
  func.func @transform_4(%arg0: i32, %arg1: i32) -> (i32, i32) {
    %c0_i32 = arith.constant 0 : i32
    %c0_i32_0 = arith.constant 0 : i32
    return %arg0, %c0_i32 : i32, i32
  }
}

</mosaic_0001>

<bundles_post_ra>
// kernel: forward_prepared.1
= control target key start
LH: loop header
LB: loop body
LE: loop exit
PB: predicated region body
PF: predicated region fallthrough
CT: control target
= control target key end

     0   :  { %10 = vsyncpa [#allocation3], 0  ;;  %s304_s0 = inlined_call_operand.hbm [shape: f32[8,32], index: 0, kind: input, shape index: {}]   ;;  %s305_s1 = inlined_call_operand.hbm [shape: f32[32,128], index: 1, kind: input, shape index: {}]   ;;  %s306_s2 = inlined_call_operand.vmem [shape: f32[1,128], index: 2, kind: input, shape index: {}]   ;;  %s307_s3 = inlined_call_operand.hbm [shape: f32[8,128], index: 3, kind: output, shape index: {0}]   ;;  %s308_s4 = inlined_call_operand.hbm [shape: f32[8,128], index: 4, kind: output, shape index: {1}]  }
   0x1   :  { %11 = vsyncpa [#allocation6], 0 }
   0x2   :  { %12 = vsyncpa [#allocation4], 0 }
   0x3   :  { %13 = vsyncpa [#allocation9], 0  ;;  %s19_s17 = sshll.u32 %s304_s0, 4  ;;  %s258_s18 = smov [#allocation2]   ;;  %s20_s17 = int_to_ptr.hbm [resolvable:$true] %s19_s17 }
   0x4   :  { %s21_s19 = sshll.u32 %s258_s18, 4  ;;  %s29_s22 = sshll.u32 %s305_s1, 4  ;;  %s22_s19 = int_to_ptr.vmem [resolvable:$true] %s21_s19  ;;  %s30_s22 = int_to_ptr.hbm [resolvable:$true] %s29_s22 }
   0x5   :  { %24 = dma.hbm_to_vmem [thread:$0]  %s20_s17, 128, %s22_s19, [#allocation3]  }
   0x6   :  { %s259_s23 = smov [#allocation5]   ;;  %s260_s25 = smov 128  }
   0x7   :  { %s31_s24 = sshll.u32 %s259_s23, 4  ;;  %s261_s26 = smov 8   ;;  %s32_s24 = int_to_ptr.vmem [resolvable:$true] %s31_s24 }
   0x8   :  { %37 = dma.hbm_to_vmem [thread:$0]  %s30_s22, 512, %s32_s24, [#allocation6], %s260_s25, %s260_s25, %s261_s26  }
   0x9   :  { %250 = dma.done.wait [#allocation3], 128  }
   0xa   :  { %251 = vsyncadd [#allocation3], 4294967168 }
   0xb   :  { %252 = dma.done.wait [#allocation6], 512  }
   0xc   :  { %253 = vsyncadd [#allocation6], 4294966784  ;;  %v62_v0 = vld [vmem:[#allocation5 + $0x18] sm:$0xff]  ;;  %v61_v1 = vld [vmem:[#allocation5 + $0x10] sm:$0xff]  ;;  %vm63_vm0 = vcmask 261120   ;;  %s262_s27 = smov [#allocation7]  }
   0xd   :  { %79 = vmatpush.msra.mxu0 %v62_v0  ;;  %v60_v2 = vld [vmem:[#allocation5 + $0x8] sm:$0xff]  ;;  %v59_v3 = vld [vmem:[#allocation5] sm:$0xff]  ;;  %v58_v4 = vld [vmem:[#allocation2] sm:$0xff]  ;;  %s113_s28 = sshll.u32 %s262_s27, 4  ;;  %s115_s5 = sshll.u32 %s307_s3, 4  ;;  %s114_s28 = int_to_ptr.vmem [resolvable:$true] %s113_s28  ;;  %s116_s5 = int_to_ptr.hbm [resolvable:$true] %s115_s5 }
   0xe   :  { %v149_v5 = vld [vmem:[%s306_s2] ss:$0 sm:$0xff]  ;;  %s263_s2 = smov [#allocation8]   ;;  %s126_s9 = sshll.u32 %s308_s4, 4  ;;  %s127_s9 = int_to_ptr.hbm [resolvable:$true] %s126_s9 }
   0xf   :  { %80 = vmatpush.msra.mxu0 %v61_v1  ;;  %s124_s6 = sshll.u32 %s263_s2, 4  ;;  %s125_s6 = int_to_ptr.vmem [resolvable:$true] %s124_s6 }
  0x11   :  { %81 = vmatpush.msra.mxu0 %v60_v2 }
  0x13   :  { %82 = vmatpush.msra.mxu0 %v59_v3 }
  0x14   :  { %142 = vmatmul.msk.f32.vlgmr.msra.gmra.mxu0 %vm63_vm0, %v58_v4 }
  0x91   :  { %v84_v6 = vpop.f32.mrf.mxu0 }
  0x92   :  { %v87_v7 = vadd.f32 %v149_v5, %v84_v6 }
  0x94   :  { %88 = vst [vmem:[#allocation7] sm:$0xff] %v87_v7  ;;  %93 = vmax.xlane.f32.xlu0 %v87_v7 }
  0x95   :  { %118 = dma.vmem_to_hbm [thread:$0]  %s114_s28, 128, %s116_s5, [#allocation4]  }
 0x107   :  { %v94_v8 = vpop.xlane.xlu0 %93 }
 0x108   :  { %v95_v9 = vsub.f32 %v87_v7, %v94_v8 }
 0x10a   :  { %v96_v10 = vmul.f32 1.442695, %v95_v9 }
 0x10c   :  { %150 = vpow2.f32 %v96_v10 }
 0x112   :  { %v151_v11 = vpop.eup %150 }
 0x113   :  { %100 = vadd.xlane.f32.xlu0 %v151_v11 }
 0x186   :  { %v101_v12 = vpop.xlane.xlu0 %100 }
 0x187   :  { %152 = vrcp.f32 %v101_v12 }
 0x18d   :  { %v153_v13 = vpop.eup %152 }
 0x18e   :  { %v103_v14 = vmul.f32 %v153_v13, %v101_v12 }
 0x190   :  { %v104_v15 = vsub.f32 2.0, %v103_v14 }
 0x192   :  { %v105_v16 = vmul.f32 %v153_v13, %v104_v15 }
 0x194   :  { %v106_v17 = vmul.f32 %v151_v11, %v105_v16 }
 0x196   :  { %107 = vst [vmem:[#allocation8] sm:$0xff] %v106_v17 }
 0x197   :  { %129 = dma.vmem_to_hbm [thread:$0]  %s125_s6, 128, %s127_s9, [#allocation9]  }
 0x198   :  { %254 = dma.done.wait [#allocation4], 128  }
 0x199   :  { %255 = vsyncadd [#allocation4], 4294967168 }
 0x19a   :  { %256 = dma.done.wait [#allocation9], 128  }
 0x19b   :  { %257 = vsyncadd [#allocation9], 4294967168 }
 0x19c   :  { %138 = vsyncpa [#allocation3], 1 }
 0x19d   :  { %139 = vsyncpa [#allocation6], 1 }
 0x19e   :  { %140 = vsyncpa [#allocation4], 1 }
 0x19f   :  { %141 = vsyncpa [#allocation9], 1 }

</bundles_post_ra>
